<compile_context>
chip_gen: v6e
topology: v6e:2x2x1
jax: 0.10.0
libtpu: 0.0.40
codegen_flags: <defaults>
</compile_context>

<pallas_src>
import jax
import jax.numpy as jnp
from jax.experimental import pallas as pl
from jax.experimental.pallas import tpu as pltpu


def _round_up(n, m):
    return pl.cdiv(n, m) * m


def make_frn_kernel(num_layers, compute_dtype):
    """Fused MLP kernel for `num_layers` linear layers.

    Ref order: x_ref, W0, (W1, b1), ..., (W_{L-1}, b_{L-1}), out_ref
    (first layer has no bias, all later layers do).  Weights are (in, out),
    biases are (1, out).
    """

    def kernel(*refs):
        x_ref = refs[0]
        o_ref = refs[-1]
        param_refs = refs[1:-1]

        h = x_ref[...]  # (block_m, d0) in compute_dtype
        idx = 0
        for i in range(num_layers):
            w = param_refs[idx][...]
            idx += 1
            # MXU matmul, f32 accumulation.
            acc = jnp.dot(h, w, preferred_element_type=jnp.float32)
            if i > 0:  # first layer has bias=False
                b = param_refs[idx][...]
                idx += 1
                acc = acc + b
            if i < num_layers - 1:
                # gate = (g_x >= 0) * h with g path == w path  ==  ReLU(h)
                acc = jnp.maximum(acc, 0.0)
                h = acc.astype(compute_dtype)
            else:
                o_ref[...] = acc.astype(o_ref.dtype)

    return kernel


def frn_forward(x, params, *, block_m=256, param_dtype=jnp.bfloat16, lane=128):
    """x: (B, inp_dim) f32.  params: list of (W_t, b) with W_t (in, out), b (1, out) or None."""
    B, inp_dim = x.shape
    num_layers = len(params)
    outp_dim = params[-1][0].shape[1]

    # Feature dims padded to lane multiples (lane-dense matmuls & stores).
    dims = [inp_dim] + [w_t.shape[1] for w_t, _ in params]
    dims_p = [_round_up(d, lane) for d in dims]

    # Batch tile: multiple of 8, no larger than the (padded) batch.
    bm = max(8, _round_up(min(block_m, _round_up(B, 8)), 8))
    b_pad = _round_up(B, bm)

    x_p = jnp.pad(x.astype(param_dtype), ((0, b_pad - B), (0, dims_p[0] - inp_dim)))

    flat_params = []
    in_specs = [pl.BlockSpec((bm, dims_p[0]), lambda i: (i, 0))]
    for li, (w_t, b) in enumerate(params):
        d_in, d_out = w_t.shape
        w_p = jnp.pad(
            w_t.astype(param_dtype),
            ((0, dims_p[li] - d_in), (0, dims_p[li + 1] - d_out)),
        )
        flat_params.append(w_p)
        # Grid-invariant weight block: whole (padded) matrix resident in VMEM.
        in_specs.append(pl.BlockSpec(w_p.shape, lambda i: (0, 0)))
        if li > 0:
            assert b is not None
            b_p = jnp.pad(b.astype(jnp.float32), ((0, 0), (0, dims_p[li + 1] - d_out)))
            flat_params.append(b_p)
            in_specs.append(pl.BlockSpec(b_p.shape, lambda i: (0, 0)))

    kernel = make_frn_kernel(num_layers, param_dtype)

    out_p = pl.pallas_call(
        kernel,
        out_shape=jax.ShapeDtypeStruct((b_pad, dims_p[-1]), jnp.float32),
        grid_spec=pltpu.PrefetchScalarGridSpec(
            num_scalar_prefetch=0,
            grid=(b_pad // bm,),
            in_specs=in_specs,
            out_specs=pl.BlockSpec((bm, dims_p[-1]), lambda i: (i, 0)),
        ),
        compiler_params=pltpu.CompilerParams(
            dimension_semantics=("parallel",),
            vmem_limit_bytes=64 * 1024 * 1024,
        ),
    )(x_p, *flat_params)

    return out_p[:B, :outp_dim]


def init_frn_params(key, inp_dim, hidden_dims, outp_dim, bias=True):
    """Deterministic init mirroring the PyTorch module's shapes.

    Layer i: weight (out, in), kaiming-normal (std = sqrt(2 / fan_in));
    bias uniform(-1/sqrt(fan_in), 1/sqrt(fan_in)) like nn.Linear default.
    First layer has no bias.  Weights are returned transposed to (in, out).
    """
    dims_in = [inp_dim] + hidden_dims
    dims_out = hidden_dims + [outp_dim]
    params = []
    for li, (d_in, d_out) in enumerate(zip(dims_in, dims_out)):
        key, wk, bk = jax.random.split(key, 3)
        std = (2.0 / d_in) ** 0.5  # kaiming_normal_, fan_in, gain=sqrt(2)
        w = jax.random.normal(wk, (d_out, d_in), dtype=jnp.float32) * std
        w_t = jnp.transpose(w)  # (in, out)
        if li == 0 or not bias:
            b = None if li == 0 else jnp.zeros((1, d_out), jnp.float32)
        else:
            bound = 1.0 / (d_in ** 0.5)
            b = jax.random.uniform(
                bk, (1, d_out), dtype=jnp.float32, minval=-bound, maxval=bound
            )
        params.append((w_t, b))
    return params


def frn_ref(x, params):
    """Pure-JAX f32 reference of the PyTorch forward (for sanity checking)."""
    w_x = x
    g_x = x
    n = len(params)
    for i, (w_t, b) in enumerate(params):
        w_x = w_x @ w_t + (b if (i > 0 and b is not None) else 0.0)
        if i < n - 1:
            g_x = g_x @ w_t + (b if (i > 0 and b is not None) else 0.0)
            gate = (g_x >= 0.0).astype(jnp.float32)
            g_x = gate * g_x
            w_x = gate * w_x
    return w_x


if __name__ == "__main__":
    inp_dim, hidden_dims, outp_dim = 32, [64, 64], 16
    batch = 256  # 2 grid steps of 128 rows -> both v7x TensorCores get work

    key = jax.random.PRNGKey(0)
    key, xk = jax.random.split(key)
    x = jax.random.normal(xk, (batch, inp_dim), dtype=jnp.float32)

    params = init_frn_params(jax.random.PRNGKey(1), inp_dim, hidden_dims, outp_dim, bias=True)

    ref = frn_ref(x, params)

    # Exact path: f32 weights/activations -> tight check vs reference.
    out_f32 = jax.block_until_ready(
        frn_forward(x, params, block_m=128, param_dtype=jnp.float32)
    )
    assert out_f32.shape == (batch, outp_dim)
    assert jnp.allclose(out_f32, ref, atol=1e-4, rtol=1e-4), "f32 mismatch vs reference"

    # Fast path: bf16 weights/activations, f32 MXU accumulation -> loose check.
    out_bf16 = jax.block_until_ready(
        frn_forward(x, params, block_m=128, param_dtype=jnp.bfloat16)
    )
    assert out_bf16.shape == (batch, outp_dim)
    assert jnp.allclose(out_bf16, ref, atol=5e-2, rtol=5e-2), "bf16 mismatch vs reference"

    # Non-multiple batch: padded tail handled correctly (no dropped rows).
    out_tail = jax.block_until_ready(
        frn_forward(x[:37], params, block_m=128, param_dtype=jnp.float32)
    )
    assert out_tail.shape == (37, outp_dim)
    assert jnp.allclose(out_tail, ref[:37], atol=1e-4, rtol=1e-4), "tail-batch mismatch"

    print("KERNEL_OK")
</pallas_src>

<mosaic_0001>
module attributes {stable_mosaic.version = 11 : i64} {
  func.func @kernel(%arg0: i32, %arg1: memref<128x128xf32, #tpu.memory_space<vmem>>, %arg2: memref<128x128xf32, #tpu.memory_space<vmem>>, %arg3: memref<128x128xf32, #tpu.memory_space<vmem>>, %arg4: memref<1x128xf32, #tpu.memory_space<vmem>>, %arg5: memref<128x128xf32, #tpu.memory_space<vmem>>, %arg6: memref<1x128xf32, #tpu.memory_space<vmem>>, %arg7: memref<128x128xf32, #tpu.memory_space<vmem>>) attributes {dimension_semantics = [#tpu.dimension_semantics<parallel>], iteration_bounds = array<i64: 2>, scalar_prefetch = 0 : i64, scratch_operands = 0 : i64, tpu.core_type = #tpu.core_type<tc>, window_params = [{transform_indices = @transform_0, window_bounds = array<i64: 128, 128>}, {pipeline_mode = #tpu.pipeline_mode<synchronous>, transform_indices = @transform_1, window_bounds = array<i64: 128, 128>}, {pipeline_mode = #tpu.pipeline_mode<synchronous>, transform_indices = @transform_2, window_bounds = array<i64: 128, 128>}, {pipeline_mode = #tpu.pipeline_mode<synchronous>, transform_indices = @transform_3, window_bounds = array<i64: 1, 128>}, {pipeline_mode = #tpu.pipeline_mode<synchronous>, transform_indices = @transform_4, window_bounds = array<i64: 128, 128>}, {pipeline_mode = #tpu.pipeline_mode<synchronous>, transform_indices = @transform_5, window_bounds = array<i64: 1, 128>}, {transform_indices = @transform_6, window_bounds = array<i64: 128, 128>}]} {
    %c0 = arith.constant 0 : index
    %c0_0 = arith.constant 0 : index
    %0 = vector.load %arg1[%c0, %c0_0] : memref<128x128xf32, #tpu.memory_space<vmem>>, vector<128x128xf32>
    %c0_1 = arith.constant 0 : index
    %c0_2 = arith.constant 0 : index
    %1 = vector.load %arg2[%c0_1, %c0_2] : memref<128x128xf32, #tpu.memory_space<vmem>>, vector<128x128xf32>
    %cst = arith.constant dense<0.000000e+00> : vector<128x128xf32>
    %2 = tpu.matmul %0, %1, %cst {dimension_numbers = #tpu.dot_dimension_numbers<[1], [0], [0], [1], [0, 0, 1, 1], [], []>} : vector<128x128xf32>, vector<128x128xf32>, vector<128x128xf32> -> vector<128x128xf32>
    %cst_3 = arith.constant 0.000000e+00 : f32
    %3 = vector.broadcast %cst_3 : f32 to vector<128x128xf32>
    %4 = arith.maximumf %2, %3 : vector<128x128xf32>
    %c0_4 = arith.constant 0 : index
    %c0_5 = arith.constant 0 : index
    %5 = vector.load %arg3[%c0_4, %c0_5] : memref<128x128xf32, #tpu.memory_space<vmem>>, vector<128x128xf32>
    %cst_6 = arith.constant dense<0.000000e+00> : vector<128x128xf32>
    %6 = tpu.matmul %4, %5, %cst_6 {dimension_numbers = #tpu.dot_dimension_numbers<[1], [0], [0], [1], [0, 0, 1, 1], [], []>} : vector<128x128xf32>, vector<128x128xf32>, vector<128x128xf32> -> vector<128x128xf32>
    %c0_7 = arith.constant 0 : index
    %c0_8 = arith.constant 0 : index
    %7 = vector.load %arg4[%c0_7, %c0_8] : memref<1x128xf32, #tpu.memory_space<vmem>>, vector<1x128xf32>
    %8 = vector.broadcast %7 : vector<1x128xf32> to vector<128x128xf32>
    %9 = arith.addf %6, %8 : vector<128x128xf32>
    %cst_9 = arith.constant 0.000000e+00 : f32
    %10 = vector.broadcast %cst_9 : f32 to vector<128x128xf32>
    %11 = arith.maximumf %9, %10 : vector<128x128xf32>
    %c0_10 = arith.constant 0 : index
    %c0_11 = arith.constant 0 : index
    %12 = vector.load %arg5[%c0_10, %c0_11] : memref<128x128xf32, #tpu.memory_space<vmem>>, vector<128x128xf32>
    %cst_12 = arith.constant dense<0.000000e+00> : vector<128x128xf32>
    %13 = tpu.matmul %11, %12, %cst_12 {dimension_numbers = #tpu.dot_dimension_numbers<[1], [0], [0], [1], [0, 0, 1, 1], [], []>} : vector<128x128xf32>, vector<128x128xf32>, vector<128x128xf32> -> vector<128x128xf32>
    %c0_13 = arith.constant 0 : index
    %c0_14 = arith.constant 0 : index
    %14 = vector.load %arg6[%c0_13, %c0_14] : memref<1x128xf32, #tpu.memory_space<vmem>>, vector<1x128xf32>
    %15 = vector.broadcast %14 : vector<1x128xf32> to vector<128x128xf32>
    %16 = arith.addf %13, %15 : vector<128x128xf32>
    %c0_15 = arith.constant 0 : index
    %c0_16 = arith.constant 0 : index
    %17 = vector.load %arg7[%c0_15, %c0_16] : memref<128x128xf32, #tpu.memory_space<vmem>>, vector<128x128xf32>
    tpu.vector_store %arg7[%c0_15, %c0_16], %16 {strides = array<i32>} : memref<128x128xf32, #tpu.memory_space<vmem>>, vector<128x128xf32>,
    return
  }
  func.func @transform_0(%arg0: i32) -> (i32, i32) {
    %c0_i32 = arith.constant 0 : i32
    %c0_i32_0 = arith.constant 0 : i32
    return %arg0, %c0_i32 : i32, i32
  }
  func.func @transform_1(%arg0: i32) -> (i32, i32) {
    %c0_i32 = arith.constant 0 : i32
    %c0_i32_0 = arith.constant 0 : i32
    %c0_i32_1 = arith.constant 0 : i32
    return %c0_i32, %c0_i32_0 : i32, i32
  }
  func.func @transform_2(%arg0: i32) -> (i32, i32) {
    %c0_i32 = arith.constant 0 : i32
    %c0_i32_0 = arith.constant 0 : i32
    %c0_i32_1 = arith.constant 0 : i32
    return %c0_i32, %c0_i32_0 : i32, i32
  }
  func.func @transform_3(%arg0: i32) -> (i32, i32) {
    %c0_i32 = arith.constant 0 : i32
    %c0_i32_0 = arith.constant 0 : i32
    %c0_i32_1 = arith.constant 0 : i32
    return %c0_i32, %c0_i32_0 : i32, i32
  }
  func.func @transform_4(%arg0: i32) -> (i32, i32) {
    %c0_i32 = arith.constant 0 : i32
    %c0_i32_0 = arith.constant 0 : i32
    %c0_i32_1 = arith.constant 0 : i32
    return %c0_i32, %c0_i32_0 : i32, i32
  }
  func.func @transform_5(%arg0: i32) -> (i32, i32) {
    %c0_i32 = arith.constant 0 : i32
    %c0_i32_0 = arith.constant 0 : i32
    %c0_i32_1 = arith.constant 0 : i32
    return %c0_i32, %c0_i32_0 : i32, i32
  }
  func.func @transform_6(%arg0: i32) -> (i32, i32) {
    %c0_i32 = arith.constant 0 : i32
    %c0_i32_0 = arith.constant 0 : i32
    return %arg0, %c0_i32 : i32, i32
  }
}

</mosaic_0001>

<bundles_post_ra>
// kernel: tpu_custom_call.1
= control target key start
LH: loop header
LB: loop body
LE: loop exit
PB: predicated region body
PF: predicated region fallthrough
CT: control target
= control target key end

     0   :  { %11 = vsyncpa [#allocation3], 0  ;;  %s1895_s0 = inlined_call_operand.hbm [shape: f32[256,128], index: 0, kind: input, shape index: {}]   ;;  %s1896_s1 = inlined_call_operand.hbm [shape: f32[128,128], index: 1, kind: input, shape index: {}]   ;;  %s1897_s2 = inlined_call_operand.hbm [shape: f32[128,128], index: 2, kind: input, shape index: {}]   ;;  %s1898_s3 = inlined_call_operand.vmem [shape: f32[1,128], index: 3, kind: input, shape index: {}]   ;;  %s1899_s4 = inlined_call_operand.hbm [shape: f32[128,128], index: 4, kind: input, shape index: {}]   ;;  %s1900_s5 = inlined_call_operand.vmem [shape: f32[1,128], index: 5, kind: input, shape index: {}]   ;;  %s1901_s6 = inlined_call_operand.hbm [shape: f32[256,128], index: 6, kind: output, shape index: {}]  }
   0x1   :  { %13 = vsyncpa [#allocation3 + $0x1], 0 }
   0x2   :  { %14 = vsyncpa [#allocation6], 0 }
   0x3   :  { %15 = vsyncpa [#allocation9], 0 }
   0x4   :  { %16 = vsyncpa [#allocation4], 0 }
   0x5   :  { %18 = vsyncpa [#allocation4 + $0x1], 0  ;;  %s1618_s21 = smov 0   ;;  %s1620_s22 = smov 0  }
   0x6   :  { %s1622_s23 = smov 0   ;;  %s1624_s24 = smov 0  }
   0x7 LB: > { %s1639_s25 = sadd.s32 4294967295, %s1572_s24   ;;  %s993_s26 = sadd.s32 4294967294, %s1572_s24   ;;  %s1572_s24 = sphi %s1624_s24, %s1928_s24   ;;  %s1568_s23 = sphi %s1622_s23, %s1927_s23   ;;  %s1564_s22 = sphi %s1620_s22, %s1926_s22   ;;  %s1560_s21 = sphi %s1618_s21, %s1925_s21  }
   0x8   : > { %p44_p0 = scmp.ne.s32.totalorder %s1564_s22, %s1560_s21  ;;  %p1902_p1 = scmp.eq.s32.totalorder %s1639_s25, 0 }
   0x9   : > { %p173_p2 = scmp.eq.s32.totalorder %s1639_s25, 1  ;;  %p179_p3 = scmp.eq.s32.totalorder %s993_s26, 1 }
   0xa   : > { %p1648_p4 = por %p1902_p1, %p44_p0  ;;  %p994_p5 = scmp.ge.s32.totalorder %s1572_s24, 1 }
   0xb   : > { %p1653_p6 = por %p179_p3, %p44_p0  ;;  %p186_p7 = scmp.lt.s32.totalorder %s1572_s24, 3 }
   0xc   : > { %s1908_s27 = scalar_select %p1648_p4, 1, 0 }
   0xd   : > { %s1909_s28 = scalar_select %p1653_p6, 1, 0 }
   0xe   : > { %p1658_p8 = pnand %p994_p5, %p186_p7  ;;  %s1574_s30 = smov [#allocation5]  }
   0xf   : > { %s198_s7 = sshll.u32 %s1574_s30, 4  ;;  %s1575_s9 = smov [#allocation7]   ;;  %s199_s7 = int_to_ptr.vmem [resolvable:$true] %s198_s7 }
  0x10   : > { %s1910_s29 = scalar_select %p1658_p8, 1, 0 }
  0x11   : > { %p1329_p9 = pneg %p1658_p8  ;;  %s211_s10 = sshll.u32 %s1575_s9, 4  ;;  %s212_s10 = int_to_ptr.vmem [resolvable:$true] %s211_s10 }
  0x12   : > { %s1576_s11 = smov [#allocation8]   ;;  %s1405_s13 = scalar_lea.vmem %s199_s7, 2048 }
  0x13   : > { %p1667_p11 = pnand %p1329_p9, %p1902_p1  ;;  %s227_s12 = sshll.u32 %s1576_s11, 4  ;;  %s228_s12 = int_to_ptr.vmem [resolvable:$true] %s227_s12 }
  0x14   : > { %p1406_p13 = scmp.ne.s32.totalorder %s199_s7, %s1405_s13  ;;  %p1413_p5 = scmp.lt.s32.totalorder %s199_s7, %s199_s7 }
  0x15   : > { %p1396_p12 = pneg %p1667_p11  ;;  %p1414_p7 = scmp.lt.s32.totalorder %s1405_s13, %s1405_s13 }
  0x17   : > { %p1408_p0 = pnand %p1406_p13, %p1396_p12  ;;  %p1415_p9 = por %p1414_p7, %p1413_p5 }
  0x19   : > { %p1409_p3 = pneg %p1408_p0 }
  0x1b   : > { %p1416_p10 = pnand %p1415_p9, %p1409_p3 }
  0x1d   : > { %1419 = shalt.err (!%p1416_p10)
}
  0x1e   : > { %s1903_s14 = smov 128   ;;  %s1904_s15 = smov 8  }
  0x1f   : > { %1332 = dma.hbm_to_vmem [thread:$0]  (!%p1667_p11), %s1896_s1, 2048, %s199_s7, [#allocation6], %s1903_s14, %s1903_s14, %s1904_s15  }
  0x20   : > { %s1431_s18 = scalar_lea.vmem %s212_s10, 2048  ;;  %p1439_p3 = scmp.lt.s32.totalorder %s212_s10, %s212_s10 }
  0x21   : > { %p1432_p13 = scmp.ne.s32.totalorder %s212_s10, %s1431_s18  ;;  %p1440_p10 = scmp.lt.s32.totalorder %s1431_s18, %s1431_s18 }
  0x23   : > { %p1434_p0 = pnand %p1432_p13, %p1396_p12  ;;  %p1441_p7 = por %p1440_p10, %p1439_p3 }
  0x25   : > { %p1435_p5 = pneg %p1434_p0 }
  0x27   : > { %p1442_p9 = pnand %p1441_p7, %p1435_p5 }
  0x29   : > { %1445 = shalt.err (!%p1442_p9)
}
  0x2a   : > { %1335 = dma.hbm_to_vmem [thread:$0]  (!%p1667_p11), %s1897_s2, 2048, %s212_s10, [#allocation6], %s1903_s14, %s1903_s14, %s1904_s15  }
  0x2b   : > { %s1457_s26 = scalar_lea.vmem %s228_s12, 2048  ;;  %p1465_p3 = scmp.lt.s32.totalorder %s228_s12, %s228_s12 }
  0x2c   : > { %p1458_p1 = scmp.ne.s32.totalorder %s228_s12, %s1457_s26  ;;  %p1466_p5 = scmp.lt.s32.totalorder %s1457_s26, %s1457_s26 }
  0x2e   : > { %p1460_p13 = pnand %p1458_p1, %p1396_p12  ;;  %p1467_p10 = por %p1466_p5, %p1465_p3 }
  0x30   : > { %p1461_p0 = pneg %p1460_p13 }
  0x32   : > { %p1468_p7 = pnand %p1467_p10, %p1461_p0 }
  0x34   : > { %1471 = shalt.err (!%p1468_p7)
}
  0x35   : > { %1338 = dma.hbm_to_vmem [thread:$0]  (!%p1667_p11), %s1899_s4, 2048, %s228_s12, [#allocation9], %s1903_s14, %s1903_s14, %s1904_s15  }
  0x36   : > { %s1707_s9 = sadd.s32 1, %s1572_s24   ;;  %s31_s10 = sadd.s32 1, %s1568_s23 }
  0x37   : > { %s28_s8 = ssub.s32 %s1572_s24, %s1707_s9  ;;  %p38_p12 = scmp.ne.s32.totalorder %s1568_s23, %s1564_s22 }
  0x38   : > { %p29_p1 = scmp.eq.s32.totalorder %s28_s8, 0  ;;  %p39_p9 = scmp.eq.s32.totalorder %s1572_s24, 0 }
  0x39   : > { %p1350_p13 = scmp.lt.s32.totalorder %s1572_s24, 2  ;;  %p1721_p3 = por %p173_p2, %p38_p12 }
  0x3a   : > { %s1717_s11 = scalar_select %p29_p1, %s1568_s23, %s31_s10  }
  0x3b   : > { %p40_p0 = por %p39_p9, %p38_p12  ;;  %s244_s16 = sand.u32 1, %s1568_s23  }
  0x3c   : > { %s1912_s13 = scalar_select %p1721_p3, 1, 0 }
  0x3d   : > { %s1015_s17 = sshll.u32 %s1572_s24, 11  ;;  %s999_s12 = sshll.u32 %s244_s16, 7 }
  0x3e   : > { %s1730_s20 = scalar_lea.hbm %s1895_s0, %s1015_s17  ;;  %s248_s26 = scalar_lea.vmem [#allocation2], %s999_s12 }
  0x3f   : > { %s255_s30 = sshll.u32 %s248_s26, 4  ;;  %p1732_p11 = pnand %p1350_p13, %p40_p0  ;;  %s1736_s30 = int_to_ptr.vmem [resolvable:$true] %s255_s30 }
  0x40   : > { %s1738_s8 = scalar_lea.sflag [#allocation3], %s244_s16  ;;  %s1472_s10 = scalar_lea.hbm %s1730_s20, 2048 }
  0x41   : > { %p1473_p2 = scmp.ne.s32.totalorder %s1730_s20, %s1472_s10  ;;  %p1474_p5 = pneg %p1732_p11 }
  0x42   : > { %s1477_s12 = scalar_lea.hbm %s1895_s0, 4096  ;;  %p1478_p1 = scmp.lt.s32.totalorder %s1730_s20, %s1895_s0 }
  0x43   : > { %p1475_p10 = pnand %p1474_p5, %p1473_p2  ;;  %p1479_p12 = scmp.lt.s32.totalorder %s1477_s12, %s1472_s10 }
  0x45   : > { %p1476_p7 = pneg %p1475_p10  ;;  %p1480_p9 = por %p1479_p12, %p1478_p1 }
  0x47   : > { %p1481_p13 = pnand %p1480_p9, %p1476_p7 }
  0x49   : > { %1484 = shalt.err (!%p1481_p13)
}
  0x4a   : > { %s1485_s16 = scalar_lea.vmem %s1736_s30, 2048  ;;  %s1579_s14 = smov [#allocation2]  }
  0x4b   : > { %p1486_p0 = scmp.ne.s32.totalorder %s1736_s30, %s1485_s16  ;;  %s1490_s15 = sshll.u32 %s1579_s14, 4  ;;  %s1491_s15 = int_to_ptr.vmem [resolvable:$false] %s1490_s15 }
  0x4c   : > { %s1492_s17 = scalar_lea.vmem %s1491_s15, 4096  ;;  %p1493_p10 = scmp.lt.s32.totalorder %s1736_s30, %s1491_s15 }
  0x4d   : > { %p1488_p6 = pnand %p1486_p0, %p1474_p5  ;;  %p1494_p3 = scmp.lt.s32.totalorder %s1492_s17, %s1485_s16 }
  0x4f   : > { %p1489_p2 = pneg %p1488_p6  ;;  %p1495_p4 = por %p1494_p3, %p1493_p10 }
  0x51   : > { %p1496_p8 = pnand %p1495_p4, %p1489_p2 }
  0x53   : > { %1499 = shalt.err (!%p1496_p8)
}
  0x54   : > { %s1914_s10 = smov 8   ;;  %s1915_s18 = smov 128  }
  0x55   : > { %1342 = dma.hbm_to_vmem [thread:$0]  (!%p1732_p11), %s1730_s20, 2048, %s1736_s30, %s1738_s8, %s1915_s18, %s1915_s18, %s1914_s10  }
  0x56   : > { %p1916_p6 = scmp.ne.s32.totalorder %s1910_s29, 0 }
  0x57   : > { %s1765_s14 = sand.u32 (!%p1916_p6), 1, %s1564_s22   ;;  %p1917_p4 = scmp.ne.s32.totalorder (!%p1916_p6), %s1908_s27, 0 }
  0x58   : > { %267 = sbr.rel (%p1916_p6) target bundleno = 771 (0x303), region = 44  ;;  %s1003_s15 = sshll.u32 (!%p1916_p6), %s1765_s14, 7 }
  0x59   : > { %s270_s12 = scalar_lea.sflag (!%p1916_p6), [#allocation3], %s1765_s14  ;;  %s1771_s7 = scalar_lea.vmem (!%p1916_p6), [#allocation2], %s1003_s15 }
  0x5d   : > { %1543 = dma.done.wait (%p1917_p4), %s270_s12, 2048  }
  0x5e   : > { %1545 = vsyncadd (%p1917_p4), %s270_s12, 4294965248  ;;  %p1918_p8 = scmp.eq.s32.totalorder %s1639_s25, 0 }
  0x60   : > { %1547 = dma.done.wait (%p1918_p8), [#allocation6], 4096   ;;  %p1919_p3 = pmov %p1918_p8 }
  0x62   : > { %1549 = vsyncadd (%p1919_p3), [#allocation6], 4294963200  ;;  %p1920_p11 = pmov %p1919_p3 }
  0x63   : > { %p1921_p5 = pmov %p1919_p3 }
  0x64   : > { %1551 = dma.done.wait (%p1920_p11), [#allocation9], 2048  }
  0x65   : > { %1553 = vsyncadd (%p1921_p5), [#allocation9], 4294965248  ;;  %v347_v0 = vld [vmem:[#allocation5 + $0x78] sm:$0xff]  ;;  %v346_v1 = vld [vmem:[#allocation5 + $0x70] sm:$0xff]  ;;  %s1827_s8 = scalar_lea.vmem [#allocation10], %s1003_s15  ;;  %s1016_s19 = sshll.u32 %s1639_s25, 11 }
  0x66   : > { %1113 = vmatprep.subr.mxu0 %v347_v0  ;;  %v345_v2 = vld [vmem:[#allocation5 + $0x68] sm:$0xff]  ;;  %v344_v3 = vld [vmem:[#allocation5 + $0x60] sm:$0xff]  ;;  %v343_v5 = vld [vmem:[#allocation5 + $0x58] sm:$0xff]  ;;  %s891_s26 = sshll.u32 %s1827_s8, 4  ;;  %s1848_s10 = scalar_lea.hbm %s1901_s6, %s1016_s19  ;;  %s1850_s26 = int_to_ptr.vmem [resolvable:$true] %s891_s26 }
  0x67   : > { %1114 = vmatpush3.msra.mxu0 %v347_v0  ;;  %v316_v4 = vld [vmem:[%s1771_s7] sm:$0xff]  ;;  %v342_v6 = vld [vmem:[#allocation5 + $0x50] sm:$0xff]  ;;  %v341_v7 = vld [vmem:[#allocation5 + $0x48] sm:$0xff]  ;;  %s878_s18 = scalar_lea.sflag [#allocation4], %s1765_s14  ;;  %s1500_s25 = scalar_lea.vmem %s1850_s26, 2048 }
  0x68   : > { %1115 = vmatprep.subr.mxu0 %v346_v1  ;;  %1145 = vmatprep.mubr.f32.mxu0 %v316_v4  ;;  %v524_v8 = vld [vmem:[#allocation7 + $0x78] sm:$0xff]  ;;  %v523_v9 = vld [vmem:[#allocation7 + $0x70] sm:$0xff]  ;;  %v340_v10 = vld [vmem:[#allocation5 + $0x40] sm:$0xff]  ;;  %p1501_p7 = scmp.ne.s32.totalorder %s1850_s26, %s1500_s25  ;;  %p1922_p1 = scmp.ne.s32.totalorder %s1912_s13, 0 }
  0x69   : > { %1116 = vmatpush3.msra.mxu0 %v346_v1  ;;  %1169 = vmatprep.subr.mxu1 %v524_v8  ;;  %v522_v11 = vld [vmem:[#allocation7 + $0x68] sm:$0xff]  ;;  %v339_v12 = vld [vmem:[#allocation5 + $0x38] sm:$0xff]  ;;  %v521_v13 = vld [vmem:[#allocation7 + $0x60] sm:$0xff]  ;;  %s1580_s15 = smov [#allocation10]  }
  0x6a   : > { %1117 = vmatprep.subr.mxu0 %v345_v2  ;;  %1170 = vmatpush3.msra.mxu1 %v524_v8  ;;  %v338_v14 = vld [vmem:[#allocation5 + $0x30] sm:$0xff]  ;;  %v520_v15 = vld [vmem:[#allocation7 + $0x58] sm:$0xff]  ;;  %v337_v16 = vld [vmem:[#allocation5 + $0x28] sm:$0xff]  ;;  %p1502_p12 = pnand %p1501_p7, %p1922_p1  ;;  %s1504_s12 = sshll.u32 %s1580_s15, 4  ;;  %s1505_s12 = int_to_ptr.vmem [resolvable:$false] %s1504_s12 }
  0x6b   : > { %1118 = vmatpush3.msra.mxu0 %v345_v2  ;;  %1171 = vmatprep.subr.mxu1 %v523_v9  ;;  %v519_v17 = vld [vmem:[#allocation7 + $0x50] sm:$0xff]  ;;  %v336_v18 = vld [vmem:[#allocation5 + $0x20] sm:$0xff]  ;;  %v518_v19 = vld [vmem:[#allocation7 + $0x48] sm:$0xff]  ;;  %p1507_p13 = scmp.lt.s32.totalorder %s1850_s26, %s1505_s12 }
  0x6c   : > { %1119 = vmatprep.subr.mxu0 %v344_v3  ;;  %1172 = vmatpush3.msra.mxu1 %v523_v9  ;;  %v335_v20 = vld [vmem:[#allocation5 + $0x18] sm:$0xff]  ;;  %v517_v21 = vld [vmem:[#allocation7 + $0x40] sm:$0xff]  ;;  %v334_v22 = vld [vmem:[#allocation5 + $0x10] sm:$0xff]  ;;  %p1503_p9 = pneg %p1502_p12 }
  0x6d   : > { %1120 = vmatpush3.msra.mxu0 %v344_v3  ;;  %1173 = vmatprep.subr.mxu1 %v522_v11  ;;  %v516_v23 = vld [vmem:[#allocation7 + $0x38] sm:$0xff]  ;;  %v333_v24 = vld [vmem:[#allocation5 + $0x8] sm:$0xff]  ;;  %v515_v25 = vld [vmem:[#allocation7 + $0x30] sm:$0xff] }
  0x6e   : > { %1121 = vmatprep.subr.mxu0 %v343_v5  ;;  %1174 = vmatpush3.msra.mxu1 %v522_v11  ;;  %v332_v26 = vld [vmem:[#allocation5] sm:$0xff]  ;;  %v514_v27 = vld [vmem:[#allocation7 + $0x28] sm:$0xff]  ;;  %v318_v30 = vld [vmem:[%s1771_s7 + $0x10] sm:$0xff] }
  0x6f   : > { %1122 = vmatpush3.msra.mxu0 %v343_v5  ;;  %1175 = vmatprep.subr.mxu1 %v521_v13  ;;  %v317_v28 = vld [vmem:[%s1771_s7 + $0x8] sm:$0xff]  ;;  %v513_v29 = vld [vmem:[#allocation7 + $0x20] sm:$0xff]  ;;  %v512_v31 = vld [vmem:[#allocation7 + $0x18] sm:$0xff] }
  0x70   : > { %1123 = vmatprep.subr.mxu0 %v342_v6  ;;  %1176 = vmatpush3.msra.mxu1 %v521_v13  ;;  %v319_v32 = vld [vmem:[%s1771_s7 + $0x18] sm:$0xff]  ;;  %v320_v33 = vld [vmem:[%s1771_s7 + $0x20] sm:$0xff]  ;;  %v321_v34 = vld [vmem:[%s1771_s7 + $0x28] sm:$0xff] }
  0x71   : > { %1124 = vmatpush3.msra.mxu0 %v342_v6  ;;  %1177 = vmatprep.subr.mxu1 %v520_v15  ;;  %v322_v35 = vld [vmem:[%s1771_s7 + $0x30] sm:$0xff]  ;;  %v323_v36 = vld [vmem:[%s1771_s7 + $0x38] sm:$0xff]  ;;  %v324_v37 = vld [vmem:[%s1771_s7 + $0x40] sm:$0xff] }
  0x72   : > { %1125 = vmatprep.subr.mxu0 %v341_v7  ;;  %1178 = vmatpush3.msra.mxu1 %v520_v15  ;;  %v325_v38 = vld [vmem:[%s1771_s7 + $0x48] sm:$0xff]  ;;  %v326_v39 = vld [vmem:[%s1771_s7 + $0x50] sm:$0xff]  ;;  %v327_v40 = vld [vmem:[%s1771_s7 + $0x58] sm:$0xff] }
  0x73   : > { %1126 = vmatpush3.msra.mxu0 %v341_v7  ;;  %1179 = vmatprep.subr.mxu1 %v519_v17  ;;  %v328_v41 = vld [vmem:[%s1771_s7 + $0x60] sm:$0xff]  ;;  %v329_v42 = vld [vmem:[%s1771_s7 + $0x68] sm:$0xff]  ;;  %v330_v43 = vld [vmem:[%s1771_s7 + $0x70] sm:$0xff] }
  0x74   : > { %1127 = vmatprep.subr.mxu0 %v340_v10  ;;  %1180 = vmatpush3.msra.mxu1 %v519_v17  ;;  %v331_v44 = vld [vmem:[%s1771_s7 + $0x78] sm:$0xff]  ;;  %v511_v45 = vld [vmem:[#allocation7 + $0x10] sm:$0xff]  ;;  %v510_v46 = vld [vmem:[#allocation7 + $0x8] sm:$0xff]  ;;  %s1506_s7 = scalar_lea.vmem %s1505_s12, 4096 }
  0x75   : > { %1128 = vmatpush3.msra.mxu0 %v340_v10  ;;  %1181 = vmatprep.subr.mxu1 %v518_v19  ;;  %v509_v47 = vld [vmem:[#allocation7] sm:$0xff]  ;;  %v708_v48 = vld [vmem:[#allocation8 + $0x78] sm:$0xff]  ;;  %v707_v49 = vld [vmem:[#allocation8 + $0x70] sm:$0xff]  ;;  %p1508_p0 = scmp.lt.s32.totalorder %s1506_s7, %s1500_s25 }
  0x76   : > { %1129 = vmatprep.subr.mxu0 %v339_v12  ;;  %1182 = vmatpush3.msra.mxu1 %v518_v19  ;;  %v706_v50 = vld [vmem:[#allocation8 + $0x68] sm:$0xff]  ;;  %v705_v51 = vld [vmem:[#allocation8 + $0x60] sm:$0xff]  ;;  %v704_v52 = vld [vmem:[#allocation8 + $0x58] sm:$0xff] }
  0x77   : > { %1130 = vmatpush3.msra.mxu0 %v339_v12  ;;  %1183 = vmatprep.subr.mxu1 %v517_v21  ;;  %v703_v53 = vld [vmem:[#allocation8 + $0x50] sm:$0xff]  ;;  %v702_v54 = vld [vmem:[#allocation8 + $0x48] sm:$0xff]  ;;  %v701_v55 = vld [vmem:[#allocation8 + $0x40] sm:$0xff]  ;;  %p1509_p2 = por %p1508_p0, %p1507_p13 }
  0x78   : > { %1131 = vmatprep.subr.mxu0 %v338_v14  ;;  %1184 = vmatpush3.msra.mxu1 %v517_v21  ;;  %v700_v56 = vld [vmem:[#allocation8 + $0x38] sm:$0xff]  ;;  %v1801_v57 = vld [vmem:[#allocation8 + $0x30] sm:$0xff]  ;;  %v1803_v58 = vld [vmem:[#allocation8 + $0x28] sm:$0xff] }
  0x79   : > { %1132 = vmatpush3.msra.mxu0 %v338_v14  ;;  %1185 = vmatprep.subr.mxu1 %v516_v23  ;;  %v1807_v59 = vld [vmem:[#allocation8 + $0x20] sm:$0xff]  ;;  %p1510_p10 = pnand %p1509_p2, %p1503_p9 }
  0x7a   : > { %1133 = vmatprep.subr.mxu0 %v337_v16  ;;  %1186 = vmatpush3.msra.mxu1 %v516_v23 }
  0x7b   : > { %1134 = vmatpush3.msra.mxu0 %v337_v16  ;;  %1187 = vmatprep.subr.mxu1 %v515_v25 }
  0x7c   : > { %1135 = vmatprep.subr.mxu0 %v336_v18  ;;  %1188 = vmatpush3.msra.mxu1 %v515_v25 }
  0x7d   : > { %1136 = vmatpush3.msra.mxu0 %v336_v18  ;;  %1189 = vmatprep.subr.mxu1 %v514_v27 }
  0x7e   : > { %1137 = vmatprep.subr.mxu0 %v335_v20  ;;  %1190 = vmatpush3.msra.mxu1 %v514_v27 }
  0x7f   : > { %1138 = vmatpush3.msra.mxu0 %v335_v20  ;;  %1191 = vmatprep.subr.mxu1 %v513_v29 }
  0x80   : > { %1139 = vmatprep.subr.mxu0 %v334_v22  ;;  %1192 = vmatpush3.msra.mxu1 %v513_v29  ;;  %v695_v29 = vld [vmem:[#allocation8 + $0x10] sm:$0xff] }
  0x81   : > { %1140 = vmatpush3.msra.mxu0 %v334_v22  ;;  %1193 = vmatprep.subr.mxu1 %v512_v31 }
  0x82   : > { %1141 = vmatprep.subr.mxu0 %v333_v24  ;;  %1194 = vmatpush3.msra.mxu1 %v512_v31  ;;  %v693_v31 = vld [vmem:[#allocation8] sm:$0xff] }
  0x83   : > { %1142 = vmatpush3.msra.mxu0 %v333_v24  ;;  %1195 = vmatprep.subr.mxu1 %v511_v45 }
  0x84   : > { %1143 = vmatprep.subr.mxu0 %v332_v26  ;;  %1196 = vmatpush3.msra.mxu1 %v511_v45 }
  0x85   : > { %1144 = vmatpush3.msra.mxu0 %v332_v26  ;;  %1197 = vmatprep.subr.mxu1 %v510_v46 }
  0x86   : > { %1146 = vmatmul.mubr.f32.vlgmr.msra.gmra.mxu0 %v317_v28  ;;  %1198 = vmatpush3.msra.mxu1 %v510_v46  ;;  %v696_v28 = vld [vmem:[#allocation8 + $0x18] sm:$0xff] }
  0x87   : > { %1148 = vmatprep.mubr.f32.mxu0 %v318_v30  ;;  %1199 = vmatprep.subr.mxu1 %v509_v47  ;;  %v694_v30 = vld [vmem:[#allocation8 + $0x8] sm:$0xff] }
  0x88   : > { %1200 = vmatpush3.msra.mxu1 %v509_v47  ;;  %1225 = vmatprep.subr.mxu0 %v708_v48 }
  0x89   : > { %1281 = vmatprep.subr.mxu1 %v708_v48  ;;  %1226 = vmatpush3.msra.mxu0 %v708_v48 }
  0x8a   : > { %1149 = vmatmul.mubr.f32.gmra.mxu0 %v319_v32  ;;  %1227 = vmatprep.subr.mxu0 %v707_v49  ;;  %v1008_v32 = vld [vmem:[%s1898_s3] ss:$0 sm:$0xff] }
  0x8b   : > { %1151 = vmatprep.mubr.f32.mxu0 %v320_v33  ;;  %1228 = vmatpush3.msra.mxu0 %v707_v49 }
  0x8c   : > { %1229 = vmatprep.subr.mxu0 %v706_v50 }
  0x8d   : > { %1230 = vmatpush3.msra.mxu0 %v706_v50 }
  0x8e   : > { %1152 = vmatmul.mubr.f32.gmra.mxu0 %v321_v34  ;;  %1231 = vmatprep.subr.mxu0 %v705_v51 }
  0x8f   : > { %1154 = vmatprep.mubr.f32.mxu0 %v322_v35  ;;  %1232 = vmatpush3.msra.mxu0 %v705_v51 }
  0x90   : > { %1233 = vmatprep.subr.mxu0 %v704_v52 }
  0x91   : > { %1234 = vmatpush3.msra.mxu0 %v704_v52 }
  0x92   : > { %1155 = vmatmul.mubr.f32.gmra.mxu0 %v323_v36  ;;  %1235 = vmatprep.subr.mxu0 %v703_v53 }
  0x93   : > { %1157 = vmatprep.mubr.f32.mxu0 %v324_v37  ;;  %1236 = vmatpush3.msra.mxu0 %v703_v53 }
  0x94   : > { %1237 = vmatprep.subr.mxu0 %v702_v54 }
  0x95   : > { %1238 = vmatpush3.msra.mxu0 %v702_v54 }
  0x96   : > { %1158 = vmatmul.mubr.f32.gmra.mxu0 %v325_v38  ;;  %1239 = vmatprep.subr.mxu0 %v701_v55 }
  0x97   : > { %1160 = vmatprep.mubr.f32.mxu0 %v326_v39  ;;  %1240 = vmatpush3.msra.mxu0 %v701_v55 }
  0x98   : > { %1241 = vmatprep.subr.mxu0 %v700_v56 }
  0x99   : > { %1242 = vmatpush3.msra.mxu0 %v700_v56 }
  0x9a   : > { %1161 = vmatmul.mubr.f32.gmra.mxu0 %v327_v40  ;;  %1243 = vmatprep.subr.mxu0 %v1801_v57 }
  0x9b   : > { %1163 = vmatprep.mubr.f32.mxu0 %v328_v41  ;;  %1244 = vmatpush3.msra.mxu0 %v1801_v57 }
  0x9c   : > { %1245 = vmatprep.subr.mxu0 %v1803_v58 }
  0x9d   : > { %1246 = vmatpush3.msra.mxu0 %v1803_v58 }
  0x9e   : > { %1164 = vmatmul.mubr.f32.gmra.mxu0 %v329_v42  ;;  %1247 = vmatprep.subr.mxu0 %v1807_v59 }
  0x9f   : > { %1166 = vmatprep.mubr.f32.mxu0 %v330_v43  ;;  %1248 = vmatpush3.msra.mxu0 %v1807_v59 }
  0xa0   : > { %1249 = vmatprep.subr.mxu0 %v696_v28 }
  0xa1   : > { %1250 = vmatpush3.msra.mxu0 %v696_v28 }
  0xa2   : > { %1167 = vmatmul.mubr.f32.gmra.mxu0 %v331_v44  ;;  %1251 = vmatprep.subr.mxu0 %v695_v29 }
  0xa3   : > { %1252 = vmatpush3.msra.mxu0 %v695_v29 }
  0xa4   : > { %1253 = vmatprep.subr.mxu0 %v694_v30 }
  0xa5   : > { %1254 = vmatpush3.msra.mxu0 %v694_v30 }
  0xa6   : > { %1255 = vmatprep.subr.mxu0 %v693_v31 }
  0xa7   : > { %1256 = vmatpush3.msra.mxu0 %v693_v31 }
 0x146   : > { %v1147_v60 = vpop.f32.mrf.mxu0 }
 0x147   : > { %v494_v63 = vmax.f32 %v1147_v60, 0.0 }
 0x148   : > { %v414_v61 = vpop.f32.mrf.mxu0 }
 0x149   : > { %v493_v62 = vmax.f32 %v414_v61, 0.0 }
 0x14a   : > { %v1150_v0 = vpop.f32.mrf.mxu0 }
 0x14b   : > { %1201 = vmatprep.mubr.f32.mxu1 %v493_v62  ;;  %v496_v3 = vmax.f32 %v1150_v0, 0.0 }
 0x14c   : > { %v424_v1 = vpop.f32.mrf.mxu0  ;;  %1202 = vmatmul.mubr.f32.vlgmr.msra.gmra.mxu1 %v494_v63 }
 0x14d   : > { %v495_v2 = vmax.f32 %v424_v1, 0.0  ;;  %1297 = vmatpush3.msra.mxu1 %v708_v48 }
 0x14e   : > { %v1153_v4 = vpop.f32.mrf.mxu0  ;;  %1282 = vmatprep.subr.mxu1 %v707_v49 }
 0x14f   : > { %1204 = vmatprep.mubr.f32.mxu1 %v495_v2  ;;  %1298 = vmatpush3.msra.mxu1 %v707_v49  ;;  %v498_v7 = vmax.f32 %v1153_v4, 0.0 }
 0x150   : > { %v434_v5 = vpop.f32.mrf.mxu0  ;;  %1205 = vmatmul.mubr.f32.gmra.mxu1 %v496_v3  ;;  %1283 = vmatprep.subr.mxu1 %v706_v50 }
 0x151   : > { %v497_v6 = vmax.f32 %v434_v5, 0.0  ;;  %1299 = vmatpush3.msra.mxu1 %v706_v50 }
 0x152   : > { %v1156_v8 = vpop.f32.mrf.mxu0  ;;  %1284 = vmatprep.subr.mxu1 %v705_v51 }
 0x153   : > { %1207 = vmatprep.mubr.f32.mxu1 %v497_v6  ;;  %1300 = vmatpush3.msra.mxu1 %v705_v51  ;;  %v500_v11 = vmax.f32 %v1156_v8, 0.0 }
 0x154   : > { %v444_v9 = vpop.f32.mrf.mxu0  ;;  %1208 = vmatmul.mubr.f32.gmra.mxu1 %v498_v7  ;;  %1285 = vmatprep.subr.mxu1 %v704_v52 }
 0x155   : > { %v499_v10 = vmax.f32 %v444_v9, 0.0  ;;  %1301 = vmatpush3.msra.mxu1 %v704_v52 }
 0x156   : > { %v1159_v12 = vpop.f32.mrf.mxu0  ;;  %1286 = vmatprep.subr.mxu1 %v703_v53 }
 0x157   : > { %1210 = vmatprep.mubr.f32.mxu1 %v499_v10  ;;  %1302 = vmatpush3.msra.mxu1 %v703_v53  ;;  %v502_v15 = vmax.f32 %v1159_v12, 0.0 }
 0x158   : > { %v454_v13 = vpop.f32.mrf.mxu0  ;;  %1211 = vmatmul.mubr.f32.gmra.mxu1 %v500_v11  ;;  %1287 = vmatprep.subr.mxu1 %v702_v54 }
 0x159   : > { %v501_v14 = vmax.f32 %v454_v13, 0.0  ;;  %1303 = vmatpush3.msra.mxu1 %v702_v54 }
 0x15a   : > { %v1162_v16 = vpop.f32.mrf.mxu0  ;;  %1288 = vmatprep.subr.mxu1 %v701_v55 }
 0x15b   : > { %1213 = vmatprep.mubr.f32.mxu1 %v501_v14  ;;  %1304 = vmatpush3.msra.mxu1 %v701_v55  ;;  %v504_v19 = vmax.f32 %v1162_v16, 0.0 }
 0x15c   : > { %v464_v17 = vpop.f32.mrf.mxu0  ;;  %1214 = vmatmul.mubr.f32.gmra.mxu1 %v502_v15  ;;  %1289 = vmatprep.subr.mxu1 %v700_v56 }
 0x15d   : > { %v503_v18 = vmax.f32 %v464_v17, 0.0  ;;  %1305 = vmatpush3.msra.mxu1 %v700_v56  ;;  %v1009_v17 = vld [vmem:[%s1900_s5] ss:$0 sm:$0xff] }
 0x15e   : > { %v1165_v20 = vpop.f32.mrf.mxu0  ;;  %1290 = vmatprep.subr.mxu1 %v1801_v57 }
 0x15f   : > { %1216 = vmatprep.mubr.f32.mxu1 %v503_v18  ;;  %1306 = vmatpush3.msra.mxu1 %v1801_v57  ;;  %v506_v23 = vmax.f32 %v1165_v20, 0.0 }
 0x160   : > { %v474_v21 = vpop.f32.mrf.mxu0  ;;  %1217 = vmatmul.mubr.f32.gmra.mxu1 %v504_v19  ;;  %1291 = vmatprep.subr.mxu1 %v1803_v58 }
 0x161   : > { %v505_v22 = vmax.f32 %v474_v21, 0.0  ;;  %1307 = vmatpush3.msra.mxu1 %v1803_v58 }
 0x162   : > { %v1168_v24 = vpop.f32.mrf.mxu0  ;;  %1292 = vmatprep.subr.mxu1 %v1807_v59 }
 0x163   : > { %1219 = vmatprep.mubr.f32.mxu1 %v505_v22  ;;  %1308 = vmatpush3.msra.mxu1 %v1807_v59  ;;  %v508_v27 = vmax.f32 %v1168_v24, 0.0 }
 0x164   : > { %v484_v25 = vpop.f32.mrf.mxu0  ;;  %1220 = vmatmul.mubr.f32.gmra.mxu1 %v506_v23  ;;  %1293 = vmatprep.subr.mxu1 %v696_v28 }
 0x165   : > { %v507_v26 = vmax.f32 %v484_v25, 0.0  ;;  %1309 = vmatpush3.msra.mxu1 %v696_v28 }
 0x166   : > { %1294 = vmatprep.subr.mxu1 %v695_v29 }
 0x167   : > { %1222 = vmatprep.mubr.f32.mxu1 %v507_v26  ;;  %1310 = vmatpush3.msra.mxu1 %v695_v29 }
 0x168   : > { %1223 = vmatmul.mubr.f32.gmra.mxu1 %v508_v27  ;;  %1295 = vmatprep.subr.mxu1 %v694_v30 }
 0x169   : > { %1311 = vmatpush3.msra.mxu1 %v694_v30 }
 0x16a   : > { %1296 = vmatprep.subr.mxu1 %v693_v31 }
 0x16b   : > { %1312 = vmatpush3.msra.mxu1 %v693_v31 }
 0x20c   : > { %v1203_v33 = vpop.f32.mrf.mxu1 }
 0x20d   : > { %v604_v34 = vadd.f32 %v1203_v33, %v1008_v32 }
 0x20e   : > { %v598_v35 = vpop.f32.mrf.mxu1 }
 0x20f   : > { %v599_v36 = vadd.f32 %v1008_v32, %v598_v35  ;;  %v678_v39 = vmax.f32 %v604_v34, 0.0 }
 0x210   : > { %v1206_v37 = vpop.f32.mrf.mxu1 }
 0x211   : > { %v677_v38 = vmax.f32 %v599_v36, 0.0  ;;  %v614_v40 = vadd.f32 %v1206_v37, %v1008_v32 }
 0x212   : > { %v608_v41 = vpop.f32.mrf.mxu1 }
 0x213   : > { %v609_v42 = vadd.f32 %v1008_v32, %v608_v41  ;;  %1257 = vmatprep.mubr.f32.mxu0 %v677_v38  ;;  %v680_v45 = vmax.f32 %v614_v40, 0.0 }
 0x214   : > { %v1209_v43 = vpop.f32.mrf.mxu1  ;;  %1258 = vmatmul.mubr.f32.vlgmr.msra.gmra.mxu0 %v678_v39 }
 0x215   : > { %v679_v44 = vmax.f32 %v609_v42, 0.0  ;;  %v624_v46 = vadd.f32 %v1209_v43, %v1008_v32 }
 0x216   : > { %v618_v47 = vpop.f32.mrf.mxu1 }
 0x217   : > { %v619_v48 = vadd.f32 %v1008_v32, %v618_v47  ;;  %1260 = vmatprep.mubr.f32.mxu0 %v679_v44  ;;  %v682_v51 = vmax.f32 %v624_v46, 0.0 }
 0x218   : > { %v1212_v49 = vpop.f32.mrf.mxu1  ;;  %1261 = vmatmul.mubr.f32.gmra.mxu0 %v680_v45 }
 0x219   : > { %v681_v50 = vmax.f32 %v619_v48, 0.0  ;;  %v634_v52 = vadd.f32 %v1212_v49, %v1008_v32 }
 0x21a   : > { %v628_v53 = vpop.f32.mrf.mxu1 }
 0x21b   : > { %v629_v54 = vadd.f32 %v1008_v32, %v628_v53  ;;  %1263 = vmatprep.mubr.f32.mxu0 %v681_v50  ;;  %v684_v57 = vmax.f32 %v634_v52, 0.0 }
 0x21c   : > { %v1215_v55 = vpop.f32.mrf.mxu1  ;;  %1264 = vmatmul.mubr.f32.gmra.mxu0 %v682_v51 }
 0x21d   : > { %v683_v56 = vmax.f32 %v629_v54, 0.0  ;;  %v644_v58 = vadd.f32 %v1215_v55, %v1008_v32 }
 0x21e   : > { %v638_v59 = vpop.f32.mrf.mxu1 }
 0x21f   : > { %v639_v60 = vadd.f32 %v1008_v32, %v638_v59  ;;  %1266 = vmatprep.mubr.f32.mxu0 %v683_v56  ;;  %v686_v63 = vmax.f32 %v644_v58, 0.0 }
 0x220   : > { %v1218_v61 = vpop.f32.mrf.mxu1  ;;  %1267 = vmatmul.mubr.f32.gmra.mxu0 %v684_v57 }
 0x221   : > { %v685_v62 = vmax.f32 %v639_v60, 0.0  ;;  %v654_v0 = vadd.f32 %v1218_v61, %v1008_v32 }
 0x222   : > { %v648_v1 = vpop.f32.mrf.mxu1 }
 0x223   : > { %v649_v2 = vadd.f32 %v1008_v32, %v648_v1  ;;  %1269 = vmatprep.mubr.f32.mxu1 %v685_v62  ;;  %v688_v5 = vmax.f32 %v654_v0, 0.0 }
 0x224   : > { %v1221_v3 = vpop.f32.mrf.mxu1  ;;  %1270 = vmatmul.mubr.f32.vlgmr.msra.gmra.mxu1 %v686_v63 }
 0x225   : > { %v687_v4 = vmax.f32 %v649_v2, 0.0  ;;  %v664_v6 = vadd.f32 %v1221_v3, %v1008_v32 }
 0x226   : > { %v658_v7 = vpop.f32.mrf.mxu1 }
 0x227   : > { %v659_v8 = vadd.f32 %v1008_v32, %v658_v7  ;;  %1272 = vmatprep.mubr.f32.mxu1 %v687_v4  ;;  %v690_v11 = vmax.f32 %v664_v6, 0.0 }
 0x228   : > { %v1224_v9 = vpop.f32.mrf.mxu1  ;;  %1273 = vmatmul.mubr.f32.gmra.mxu1 %v688_v5 }
 0x229   : > { %v689_v10 = vmax.f32 %v659_v8, 0.0  ;;  %v674_v12 = vadd.f32 %v1224_v9, %v1008_v32 }
 0x22a   : > { %v668_v13 = vpop.f32.mrf.mxu1 }
 0x22b   : > { %v669_v14 = vadd.f32 %v1008_v32, %v668_v13  ;;  %1275 = vmatprep.mubr.f32.mxu1 %v689_v10  ;;  %v692_v16 = vmax.f32 %v674_v12, 0.0 }
 0x22c   : > { %1276 = vmatmul.mubr.f32.gmra.mxu1 %v690_v11 }
 0x22d   : > { %v691_v15 = vmax.f32 %v669_v14, 0.0 }
 0x22f   : > { %1278 = vmatprep.mubr.f32.mxu1 %v691_v15 }
 0x230   : > { %1279 = vmatmul.mubr.f32.gmra.mxu1 %v692_v16 }
 0x2d4   : > { %v1259_v18 = vpop.f32.mrf.mxu0 }
 0x2d5   : > { %v788_v19 = vadd.f32 %v1259_v18, %v1009_v17 }
 0x2d6   : > { %v782_v20 = vpop.f32.mrf.mxu0 }
 0x2d7   : > { %862 = vst [vmem:[%s1827_s8 + $0x8] sm:$0xff] %v788_v19  ;;  %v783_v21 = vadd.f32 %v1009_v17, %v782_v20 }
 0x2d8   : > { %v1262_v22 = vpop.f32.mrf.mxu0 }
 0x2d9   : > { %861 = vst [vmem:[%s1827_s8] sm:$0xff] %v783_v21  ;;  %v798_v23 = vadd.f32 %v1262_v22, %v1009_v17 }
 0x2da   : > { %v792_v24 = vpop.f32.mrf.mxu0 }
 0x2db   : > { %864 = vst [vmem:[%s1827_s8 + $0x18] sm:$0xff] %v798_v23  ;;  %v793_v25 = vadd.f32 %v1009_v17, %v792_v24 }
 0x2dc   : > { %v1265_v26 = vpop.f32.mrf.mxu0 }
 0x2dd   : > { %863 = vst [vmem:[%s1827_s8 + $0x10] sm:$0xff] %v793_v25  ;;  %v808_v27 = vadd.f32 %v1265_v26, %v1009_v17 }
 0x2de   : > { %v802_v28 = vpop.f32.mrf.mxu0 }
 0x2df   : > { %866 = vst [vmem:[%s1827_s8 + $0x28] sm:$0xff] %v808_v27  ;;  %v803_v29 = vadd.f32 %v1009_v17, %v802_v28 }
 0x2e0   : > { %v1268_v30 = vpop.f32.mrf.mxu0 }
 0x2e1   : > { %865 = vst [vmem:[%s1827_s8 + $0x20] sm:$0xff] %v803_v29  ;;  %v818_v31 = vadd.f32 %v1268_v30, %v1009_v17 }
 0x2e2   : > { %v812_v32 = vpop.f32.mrf.mxu0 }
 0x2e3   : > { %868 = vst [vmem:[%s1827_s8 + $0x38] sm:$0xff] %v818_v31  ;;  %v813_v33 = vadd.f32 %v1009_v17, %v812_v32 }
 0x2e4   : > { %v1271_v34 = vpop.f32.mrf.mxu1 }
 0x2e5   : > { %867 = vst [vmem:[%s1827_s8 + $0x30] sm:$0xff] %v813_v33  ;;  %v828_v35 = vadd.f32 %v1271_v34, %v1009_v17 }
 0x2e6   : > { %v822_v36 = vpop.f32.mrf.mxu1 }
 0x2e7   : > { %870 = vst [vmem:[%s1827_s8 + $0x48] sm:$0xff] %v828_v35  ;;  %v823_v37 = vadd.f32 %v1009_v17, %v822_v36 }
 0x2e8   : > { %v1274_v38 = vpop.f32.mrf.mxu1 }
 0x2e9   : > { %869 = vst [vmem:[%s1827_s8 + $0x40] sm:$0xff] %v823_v37  ;;  %v838_v39 = vadd.f32 %v1274_v38, %v1009_v17 }
 0x2ea   : > { %v832_v40 = vpop.f32.mrf.mxu1 }
 0x2eb   : > { %872 = vst [vmem:[%s1827_s8 + $0x58] sm:$0xff] %v838_v39  ;;  %v833_v41 = vadd.f32 %v1009_v17, %v832_v40 }
 0x2ec   : > { %v1277_v42 = vpop.f32.mrf.mxu1 }
 0x2ed   : > { %871 = vst [vmem:[%s1827_s8 + $0x50] sm:$0xff] %v833_v41  ;;  %v848_v43 = vadd.f32 %v1277_v42, %v1009_v17 }
 0x2ee   : > { %v842_v44 = vpop.f32.mrf.mxu1 }
 0x2ef   : > { %874 = vst [vmem:[%s1827_s8 + $0x68] sm:$0xff] %v848_v43  ;;  %v843_v45 = vadd.f32 %v1009_v17, %v842_v44 }
 0x2f0   : > { %v1280_v46 = vpop.f32.mrf.mxu1 }
 0x2f1   : > { %873 = vst [vmem:[%s1827_s8 + $0x60] sm:$0xff] %v843_v45  ;;  %v858_v47 = vadd.f32 %v1280_v46, %v1009_v17 }
 0x2f2   : > { %v852_v48 = vpop.f32.mrf.mxu1 }
 0x2f3   : > { %876 = vst [vmem:[%s1827_s8 + $0x78] sm:$0xff] %v858_v47  ;;  %v853_v49 = vadd.f32 %v1009_v17, %v852_v48 }
 0x2f5   : > { %875 = vst [vmem:[%s1827_s8 + $0x70] sm:$0xff] %v853_v49 }
 0x2f6   : > { %1513 = shalt.err (!%p1510_p10)
}
 0x2f7   : > { %s1514_s27 = scalar_lea.hbm %s1848_s10, 2048  ;;  %s1518_s30 = scalar_lea.hbm %s1901_s6, 4096 }
 0x2f8   : > { %p1515_p6 = scmp.ne.s32.totalorder %s1848_s10, %s1514_s27  ;;  %p1519_p3 = scmp.lt.s32.totalorder %s1848_s10, %s1901_s6 }
 0x2f9   : > { %p1520_p11 = scmp.lt.s32.totalorder %s1518_s30, %s1514_s27 }
 0x2fa   : > { %p1516_p4 = pnand %p1515_p6, %p1922_p1 }
 0x2fb   : > { %p1521_p5 = por %p1520_p11, %p1519_p3 }
 0x2fc   : > { %p1517_p8 = pneg %p1516_p4 }
 0x2fe   : > { %p1522_p7 = pnand %p1521_p5, %p1517_p8 }
 0x300   : > { %1525 = shalt.err (!%p1522_p7)
}
 0x301   : > { %s1581_s16 = smov 128   ;;  %s1582_s17 = smov 8  }
 0x302   : > { %1327 = dma.vmem_to_hbm [thread:$0]  (%p1922_p1), %s1850_s26, 2048, %s1848_s10, %s878_s18, %s1581_s16, %s1581_s16, %s1582_s17  }
 0x303 PF: > { %s906_s25 = sand.u32 1, %s1560_s21   ;;  %p1923_p12 = scmp.ne.s32.totalorder %s1909_s28, 0 }
 0x304   : > { %p1924_p9 = scmp.ge.s32.totalorder %s1572_s24, 2  ;;  %s907_s15 = scalar_lea.sflag [#allocation4], %s906_s25 }
 0x306   : > { %p1344_p13 = pnand %p1924_p9, %p1923_p12 }
 0x308   : > { %p1345_p0 = pneg %p1344_p13 }
 0x30a   : > { %1555 = dma.done.wait (%p1345_p0), %s907_s15, 2048  }
 0x30b   : > { %1557 = vsyncadd (%p1345_p0), %s907_s15, 4294965248  ;;  %p21_p2 = scmp.ge.s32.totalorder %s1707_s9, 4   ;;  %s1925_s21 = smov %s1564_s22 }
 0x30c   : > { %s1926_s22 = smov %s1568_s23  ;;  %s1927_s23 = smov %s1717_s11 }
 0x30d   : > { %s1928_s24 = smov %s1707_s9  ;;  %23 = sbr.rel (!%p21_p2) target bundleno = 7 (0x7), region = 101 }
 0x312   :  { %912 = vsyncpa [#allocation3], 1 }
 0x313   :  { %914 = vsyncpa [#allocation3 + $0x1], 1 }
 0x314   :  { %915 = vsyncpa [#allocation6], 1 }
 0x315   :  { %916 = vsyncpa [#allocation9], 1 }
 0x316   :  { %917 = vsyncpa [#allocation4], 1 }
 0x317   :  { %919 = vsyncpa [#allocation4 + $0x1], 1 }

</bundles_post_ra>
